<compile_context>
chip_gen: v5e
topology: v5e:2x2
jax: 0.10.0
libtpu: 0.0.40
codegen_flags: <defaults>
</compile_context>

<pallas_src>
import functools

import jax
import jax.numpy as jnp
from jax.experimental import pallas as pl
from jax.experimental.pallas import tpu as pltpu


IN_DIM = 80
H1_DIM = 100
H2_DIM = 50
HEAD_DIM = 7
VAL_DIM = 1

PAD_IN = 128          # x / w1-rows padded to a full lane width
PAD_H = 128           # hidden dims 100 / 50 padded to 128
PAD_OUT = 128         # fused head output padded to a lane-dense 128
TOTAL_HEAD = 4 * HEAD_DIM + VAL_DIM   # 29 real output columns
VALUE_COL = 4 * HEAD_DIM              # column 28 holds the value head


def _round_up(n, m):
    return ((n + m - 1) // m) * m


def _flightnet_kernel(
    x_ref,            # (bb, 128)   padded input tile
    w1_ref, b1_ref,   # (128, 128), (1, 128)
    w2_ref, b2_ref,   # (128, 128), (1, 128)
    wh_ref, bh_ref,   # (128, 128), (1, 128)   fused heads (cols 0..28 real)
    out_ref,          # (bb, 128)
):
    x = x_ref[...]

    # h1 = relu(x @ W1 + b1)   (padded cols stay exactly 0)
    h = jnp.dot(x, w1_ref[...], preferred_element_type=jnp.float32) + b1_ref[...]
    h = jnp.maximum(h, 0.0).astype(x.dtype)

    # h2 = relu(h1 @ W2 + b2)
    h = jnp.dot(h, w2_ref[...], preferred_element_type=jnp.float32) + b2_ref[...]
    h = jnp.maximum(h, 0.0).astype(x.dtype)

    # single fused head matmul: [turn|fire|pitch|accel|value|zero-pad]
    out = jnp.dot(h, wh_ref[...], preferred_element_type=jnp.float32) + bh_ref[...]

    # tanh only on the value column (EUP is a free bundle slot).
    col = jax.lax.broadcasted_iota(jnp.int32, out.shape, 1)
    out_ref[...] = jnp.where(col == VALUE_COL, jnp.tanh(out), out)


@functools.partial(jax.jit, static_argnames=("block_b",))
def flightnet_forward(x, packed, block_b=512):
    """x: [B, 80] f32. packed: output of pack_params(). Returns dict of heads."""
    assert block_b % 8 == 0, "block_b must be a multiple of 8"
    B = x.shape[0]
    compute_dtype = packed["w1"].dtype

    # Effective block: don't pad a tiny batch up to 512 rows.
    bb = min(block_b, _round_up(B, 8))
    Bp = _round_up(B, bb)
    grid = (Bp // bb,)

    # Lane-pad x to 128 features and pad batch to a multiple of bb.
    xp = jnp.pad(x.astype(compute_dtype), ((0, Bp - B), (0, PAD_IN - IN_DIM)))

    def const_spec(shape):
        # Constant block index -> fetched once, stays VMEM-resident across steps.
        return pl.BlockSpec(shape, lambda i: (0,) * len(shape))

    out = pl.pallas_call(
        _flightnet_kernel,
        out_shape=jax.ShapeDtypeStruct((Bp, PAD_OUT), jnp.float32),
        grid_spec=pl.GridSpec(
            grid=grid,
            in_specs=[
                pl.BlockSpec((bb, PAD_IN), lambda i: (i, 0)),
                const_spec((PAD_IN, PAD_H)), const_spec((1, PAD_H)),
                const_spec((PAD_H, PAD_H)), const_spec((1, PAD_H)),
                const_spec((PAD_H, PAD_OUT)), const_spec((1, PAD_OUT)),
            ],
            out_specs=pl.BlockSpec((bb, PAD_OUT), lambda i: (i, 0)),
        ),
        compiler_params=pltpu.CompilerParams(
            dimension_semantics=("parallel",)),
    )(xp, packed["w1"], packed["b1"], packed["w2"], packed["b2"],
      packed["wh"], packed["bh"])

    return {
        "turn_p": out[:B, 0:HEAD_DIM],
        "fire_p": out[:B, HEAD_DIM:2 * HEAD_DIM],
        "pitch_p": out[:B, 2 * HEAD_DIM:3 * HEAD_DIM],
        "accel_p": out[:B, 3 * HEAD_DIM:4 * HEAD_DIM],
        "value": out[:B, VALUE_COL:VALUE_COL + VAL_DIM],
    }


def pack_params(p, compute_dtype=jnp.float32):
    """Zero-pad weights to lane-aligned shapes and fuse the 5 heads into one
    [128,128] matrix (cols: turn|fire|pitch|accel|value). Biases stay f32 (added
    to the f32 accumulator). Use compute_dtype=jnp.bfloat16 on v6e/v7x to halve
    HBM traffic of the dominant x stream."""
    cd = compute_dtype
    w1 = jnp.zeros((PAD_IN, PAD_H), cd).at[:IN_DIM, :H1_DIM].set(p["w1"].astype(cd))
    b1 = jnp.zeros((1, PAD_H), jnp.float32).at[:, :H1_DIM].set(p["b1"].astype(jnp.float32))
    w2 = jnp.zeros((PAD_H, PAD_H), cd).at[:H1_DIM, :H2_DIM].set(p["w2"].astype(cd))
    b2 = jnp.zeros((1, PAD_H), jnp.float32).at[:, :H2_DIM].set(p["b2"].astype(jnp.float32))
    wh_core = jnp.concatenate([p["wt"], p["wf"], p["wp"], p["wa"], p["wv"]], axis=1)  # (50, 29)
    wh = jnp.zeros((PAD_H, PAD_OUT), cd).at[:H2_DIM, :TOTAL_HEAD].set(wh_core.astype(cd))
    bh = jnp.zeros((1, PAD_OUT), jnp.float32).at[:, VALUE_COL:VALUE_COL + VAL_DIM].set(
        p["bv"].astype(jnp.float32))
    return {"w1": w1, "b1": b1, "w2": w2, "b2": b2, "wh": wh, "bh": bh}


def init_params(key):
    """Mimic nn.Linear uniform(-1/sqrt(fan_in), 1/sqrt(fan_in)) init.
    Weights stored as [in, out] (transposed vs. PyTorch)."""
    keys = jax.random.split(key, 11)

    def lin_w(k, fan_in, fan_out):
        bound = 1.0 / jnp.sqrt(jnp.float32(fan_in))
        return jax.random.uniform(k, (fan_in, fan_out), jnp.float32, -bound, bound)

    def lin_b(k, fan_in, fan_out):
        bound = 1.0 / jnp.sqrt(jnp.float32(fan_in))
        return jax.random.uniform(k, (1, fan_out), jnp.float32, -bound, bound)

    return {
        "w1": lin_w(keys[0], IN_DIM, H1_DIM), "b1": lin_b(keys[1], IN_DIM, H1_DIM),
        "w2": lin_w(keys[2], H1_DIM, H2_DIM), "b2": lin_b(keys[3], H1_DIM, H2_DIM),
        "wt": lin_w(keys[4], H2_DIM, HEAD_DIM),
        "wf": lin_w(keys[5], H2_DIM, HEAD_DIM),
        "wp": lin_w(keys[6], H2_DIM, HEAD_DIM),
        "wa": lin_w(keys[7], H2_DIM, HEAD_DIM),
        "wv": lin_w(keys[8], H2_DIM, VAL_DIM), "bv": lin_b(keys[9], H2_DIM, VAL_DIM),
    }


def _reference_forward(x, p):
    h = jnp.maximum(x @ p["w1"] + p["b1"], 0.0)
    h = jnp.maximum(h @ p["w2"] + p["b2"], 0.0)
    return {
        "turn_p": h @ p["wt"],
        "fire_p": h @ p["wf"],
        "pitch_p": h @ p["wp"],
        "accel_p": h @ p["wa"],
        "value": jnp.tanh(h @ p["wv"] + p["bv"]),
    }


if __name__ == "__main__":
    key = jax.random.PRNGKey(0)
    pkey, xkey = jax.random.split(key)
    params = init_params(pkey)
    packed = pack_params(params)          # f32 compute for tight validation

    # small batch consistent with the module's [*, 80] input
    B = 16
    x = jax.random.normal(xkey, (B, IN_DIM), jnp.float32)
    out = jax.block_until_ready(flightnet_forward(x, packed))

    ref = _reference_forward(x, params)
    for k in ("turn_p", "fire_p", "pitch_p", "accel_p", "value"):
        assert out[k].shape == ref[k].shape, (k, out[k].shape, ref[k].shape)
        assert jnp.allclose(out[k], ref[k], atol=1e-5, rtol=1e-5), k

    # ragged batch (exercises the pad-to-block path)
    x2 = jax.random.normal(jax.random.PRNGKey(2), (13, IN_DIM), jnp.float32)
    out2 = jax.block_until_ready(flightnet_forward(x2, packed))
    ref2 = _reference_forward(x2, params)
    for k in ref2:
        assert jnp.allclose(out2[k], ref2[k], atol=1e-5, rtol=1e-5), k

    print("KERNEL_OK")
</pallas_src>

<mosaic_0001>
module attributes {stable_mosaic.version = 11 : i64} {
  func.func @_flightnet_kernel(%arg0: i32, %arg1: memref<16x128xf32, #tpu.memory_space<vmem>>, %arg2: memref<128x128xf32, #tpu.memory_space<vmem>>, %arg3: memref<1x128xf32, #tpu.memory_space<vmem>>, %arg4: memref<128x128xf32, #tpu.memory_space<vmem>>, %arg5: memref<1x128xf32, #tpu.memory_space<vmem>>, %arg6: memref<128x128xf32, #tpu.memory_space<vmem>>, %arg7: memref<1x128xf32, #tpu.memory_space<vmem>>, %arg8: memref<16x128xf32, #tpu.memory_space<vmem>>) attributes {dimension_semantics = [#tpu.dimension_semantics<parallel>], iteration_bounds = array<i64: 1>, scalar_prefetch = 0 : i64, scratch_operands = 0 : i64, tpu.core_type = #tpu.core_type<tc>, window_params = [{transform_indices = @transform_0, window_bounds = array<i64: 16, 128>}, {pipeline_mode = #tpu.pipeline_mode<synchronous>, transform_indices = @transform_1, window_bounds = array<i64: 128, 128>}, {pipeline_mode = #tpu.pipeline_mode<synchronous>, transform_indices = @transform_2, window_bounds = array<i64: 1, 128>}, {pipeline_mode = #tpu.pipeline_mode<synchronous>, transform_indices = @transform_3, window_bounds = array<i64: 128, 128>}, {pipeline_mode = #tpu.pipeline_mode<synchronous>, transform_indices = @transform_4, window_bounds = array<i64: 1, 128>}, {pipeline_mode = #tpu.pipeline_mode<synchronous>, transform_indices = @transform_5, window_bounds = array<i64: 128, 128>}, {pipeline_mode = #tpu.pipeline_mode<synchronous>, transform_indices = @transform_6, window_bounds = array<i64: 1, 128>}, {transform_indices = @transform_7, window_bounds = array<i64: 16, 128>}]} {
    %c0 = arith.constant 0 : index
    %c0_0 = arith.constant 0 : index
    %0 = vector.load %arg1[%c0, %c0_0] : memref<16x128xf32, #tpu.memory_space<vmem>>, vector<16x128xf32>
    %c0_1 = arith.constant 0 : index
    %c0_2 = arith.constant 0 : index
    %1 = vector.load %arg2[%c0_1, %c0_2] : memref<128x128xf32, #tpu.memory_space<vmem>>, vector<128x128xf32>
    %cst = arith.constant dense<0.000000e+00> : vector<16x128xf32>
    %2 = tpu.matmul %0, %1, %cst {dimension_numbers = #tpu.dot_dimension_numbers<[1], [0], [0], [1], [0, 0, 1, 1], [], []>} : vector<16x128xf32>, vector<128x128xf32>, vector<16x128xf32> -> vector<16x128xf32>
    %c0_3 = arith.constant 0 : index
    %c0_4 = arith.constant 0 : index
    %3 = vector.load %arg3[%c0_3, %c0_4] : memref<1x128xf32, #tpu.memory_space<vmem>>, vector<1x128xf32>
    %4 = vector.broadcast %3 : vector<1x128xf32> to vector<16x128xf32>
    %5 = arith.addf %2, %4 : vector<16x128xf32>
    %cst_5 = arith.constant 0.000000e+00 : f32
    %6 = vector.broadcast %cst_5 : f32 to vector<16x128xf32>
    %7 = arith.maximumf %5, %6 : vector<16x128xf32>
    %c0_6 = arith.constant 0 : index
    %c0_7 = arith.constant 0 : index
    %8 = vector.load %arg4[%c0_6, %c0_7] : memref<128x128xf32, #tpu.memory_space<vmem>>, vector<128x128xf32>
    %cst_8 = arith.constant dense<0.000000e+00> : vector<16x128xf32>
    %9 = tpu.matmul %7, %8, %cst_8 {dimension_numbers = #tpu.dot_dimension_numbers<[1], [0], [0], [1], [0, 0, 1, 1], [], []>} : vector<16x128xf32>, vector<128x128xf32>, vector<16x128xf32> -> vector<16x128xf32>
    %c0_9 = arith.constant 0 : index
    %c0_10 = arith.constant 0 : index
    %10 = vector.load %arg5[%c0_9, %c0_10] : memref<1x128xf32, #tpu.memory_space<vmem>>, vector<1x128xf32>
    %11 = vector.broadcast %10 : vector<1x128xf32> to vector<16x128xf32>
    %12 = arith.addf %9, %11 : vector<16x128xf32>
    %cst_11 = arith.constant 0.000000e+00 : f32
    %13 = vector.broadcast %cst_11 : f32 to vector<16x128xf32>
    %14 = arith.maximumf %12, %13 : vector<16x128xf32>
    %c0_12 = arith.constant 0 : index
    %c0_13 = arith.constant 0 : index
    %15 = vector.load %arg6[%c0_12, %c0_13] : memref<128x128xf32, #tpu.memory_space<vmem>>, vector<128x128xf32>
    %cst_14 = arith.constant dense<0.000000e+00> : vector<16x128xf32>
    %16 = tpu.matmul %14, %15, %cst_14 {dimension_numbers = #tpu.dot_dimension_numbers<[1], [0], [0], [1], [0, 0, 1, 1], [], []>} : vector<16x128xf32>, vector<128x128xf32>, vector<16x128xf32> -> vector<16x128xf32>
    %c0_15 = arith.constant 0 : index
    %c0_16 = arith.constant 0 : index
    %17 = vector.load %arg7[%c0_15, %c0_16] : memref<1x128xf32, #tpu.memory_space<vmem>>, vector<1x128xf32>
    %18 = vector.broadcast %17 : vector<1x128xf32> to vector<16x128xf32>
    %19 = arith.addf %16, %18 : vector<16x128xf32>
    %20 = tpu.iota {dimensions = array<i32: 1>} : vector<16x128xi32>
    %c28_i32 = arith.constant 28 : i32
    %21 = vector.broadcast %c28_i32 : i32 to vector<16x128xi32>
    %22 = arith.cmpi eq, %20, %21 : vector<16x128xi32>
    %23 = math.tanh %19 : vector<16x128xf32>
    %24 = arith.select %22, %23, %19 : vector<16x128xi1>, vector<16x128xf32>
    %c0_17 = arith.constant 0 : index
    %c0_18 = arith.constant 0 : index
    %25 = vector.load %arg8[%c0_17, %c0_18] : memref<16x128xf32, #tpu.memory_space<vmem>>, vector<16x128xf32>
    tpu.vector_store %arg8[%c0_17, %c0_18], %24 {strides = array<i32>} : memref<16x128xf32, #tpu.memory_space<vmem>>, vector<16x128xf32>,
    return
  }
  func.func @transform_0(%arg0: i32) -> (i32, i32) {
    %c0_i32 = arith.constant 0 : i32
    %c0_i32_0 = arith.constant 0 : i32
    return %arg0, %c0_i32 : i32, i32
  }
  func.func @transform_1(%arg0: i32) -> (i32, i32) {
    %c0_i32 = arith.constant 0 : i32
    %c0_i32_0 = arith.constant 0 : i32
    %c0_i32_1 = arith.constant 0 : i32
    return %c0_i32, %c0_i32_0 : i32, i32
  }
  func.func @transform_2(%arg0: i32) -> (i32, i32) {
    %c0_i32 = arith.constant 0 : i32
    %c0_i32_0 = arith.constant 0 : i32
    %c0_i32_1 = arith.constant 0 : i32
    return %c0_i32, %c0_i32_0 : i32, i32
  }
  func.func @transform_3(%arg0: i32) -> (i32, i32) {
    %c0_i32 = arith.constant 0 : i32
    %c0_i32_0 = arith.constant 0 : i32
    %c0_i32_1 = arith.constant 0 : i32
    return %c0_i32, %c0_i32_0 : i32, i32
  }
  func.func @transform_4(%arg0: i32) -> (i32, i32) {
    %c0_i32 = arith.constant 0 : i32
    %c0_i32_0 = arith.constant 0 : i32
    %c0_i32_1 = arith.constant 0 : i32
    return %c0_i32, %c0_i32_0 : i32, i32
  }
  func.func @transform_5(%arg0: i32) -> (i32, i32) {
    %c0_i32 = arith.constant 0 : i32
    %c0_i32_0 = arith.constant 0 : i32
    %c0_i32_1 = arith.constant 0 : i32
    return %c0_i32, %c0_i32_0 : i32, i32
  }
  func.func @transform_6(%arg0: i32) -> (i32, i32) {
    %c0_i32 = arith.constant 0 : i32
    %c0_i32_0 = arith.constant 0 : i32
    %c0_i32_1 = arith.constant 0 : i32
    return %c0_i32, %c0_i32_0 : i32, i32
  }
  func.func @transform_7(%arg0: i32) -> (i32, i32) {
    %c0_i32 = arith.constant 0 : i32
    %c0_i32_0 = arith.constant 0 : i32
    return %arg0, %c0_i32 : i32, i32
  }
}

</mosaic_0001>

<bundles_post_ra>
// kernel: flightnet_forward.1
= control target key start
LH: loop header
LB: loop body
LE: loop exit
PB: predicated region body
PF: predicated region fallthrough
CT: control target
= control target key end

     0   :  { %12 = vsyncpa [#allocation3], 0  ;;  %s402_s0 = inlined_call_operand.vmem [shape: f32[16,128], index: 0, kind: input, shape index: {}]   ;;  %s403_s1 = inlined_call_operand.hbm [shape: f32[128,128], index: 1, kind: input, shape index: {}]   ;;  %s404_s2 = inlined_call_operand.vmem [shape: f32[1,128], index: 2, kind: input, shape index: {}]   ;;  %s405_s3 = inlined_call_operand.hbm [shape: f32[128,128], index: 3, kind: input, shape index: {}]   ;;  %s406_s4 = inlined_call_operand.vmem [shape: f32[1,128], index: 4, kind: input, shape index: {}]   ;;  %s407_s5 = inlined_call_operand.hbm [shape: f32[128,128], index: 5, kind: input, shape index: {}]   ;;  %s408_s6 = inlined_call_operand.vmem [shape: f32[1,128], index: 6, kind: input, shape index: {}]   ;;  %s409_s7 = inlined_call_operand.vmem [shape: f32[16,128], index: 7, kind: output, shape index: {}]  }
   0x1   :  { %13 = vsyncpa [#allocation5], 0  ;;  %s35_s26 = sshll.u32 %s405_s3, 4  ;;  %s327_s27 = smov [#allocation4]   ;;  %s36_s26 = int_to_ptr.hbm [resolvable:$true] %s35_s26 }
   0x2   :  { %s37_s28 = sshll.u32 %s327_s27, 4  ;;  %s20_s8 = sshll.u32 %s403_s1, 4  ;;  %s38_s28 = int_to_ptr.vmem [resolvable:$true] %s37_s28  ;;  %s21_s8 = int_to_ptr.hbm [resolvable:$true] %s20_s8 }
   0x3   :  { %s328_s9 = smov 128   ;;  %s329_s10 = smov 8  }
   0x4   :  { %43 = dma.hbm_to_vmem [thread:$0]  %s36_s26, 2048, %s38_s28, [#allocation5], %s328_s9, %s328_s9, %s329_s10  }
   0x5   :  { %s330_s11 = smov [#allocation2]   ;;  %s50_s15 = sshll.u32 %s407_s5, 4  ;;  %s51_s15 = int_to_ptr.hbm [resolvable:$true] %s50_s15 }
   0x6   :  { %s22_s12 = sshll.u32 %s330_s11, 4  ;;  %s331_s3 = smov [#allocation6]   ;;  %s23_s12 = int_to_ptr.vmem [resolvable:$true] %s22_s12 }
   0x7   :  { %28 = dma.hbm_to_vmem [thread:$0]  %s21_s8, 2048, %s23_s12, [#allocation3], %s328_s9, %s328_s9, %s329_s10  }
   0x8   :  { %s52_s16 = sshll.u32 %s331_s3, 4  ;;  %s53_s16 = int_to_ptr.vmem [resolvable:$true] %s52_s16 }
   0x9   :  { %58 = dma.hbm_to_vmem [thread:$0]  %s51_s15, 2048, %s53_s16, [#allocation5], %s328_s9, %s328_s9, %s329_s10  }
   0xa   :  { %323 = dma.done.wait [#allocation3], 2048  }
   0xb   :  { %324 = vsyncadd [#allocation3], 4294965248 }
   0xc   :  { %325 = dma.done.wait [#allocation5], 4096  }
   0xd   :  { %326 = vsyncadd [#allocation5], 4294963200  ;;  %v90_v0 = vld [vmem:[#allocation2 + $0x78] sm:$0xff]  ;;  %v89_v1 = vld [vmem:[#allocation2 + $0x70] sm:$0xff] }
   0xe   :  { %95 = vmatpush.msra.mxu0 %v90_v0  ;;  %223 = vmatpush.msra.mxu3 %v90_v0  ;;  %v88_v2 = vld [vmem:[#allocation2 + $0x68] sm:$0xff]  ;;  %v87_v3 = vld [vmem:[#allocation2 + $0x60] sm:$0xff]  ;;  %v86_v4 = vld [vmem:[#allocation2 + $0x58] sm:$0xff] }
   0xf   :  { %v135_v5 = vld [vmem:[#allocation4 + $0x78] sm:$0xff]  ;;  %v134_v6 = vld [vmem:[#allocation4 + $0x70] sm:$0xff]  ;;  %v133_v8 = vld [vmem:[#allocation4 + $0x68] sm:$0xff] }
  0x10   :  { %96 = vmatpush.msra.mxu0 %v89_v1  ;;  %224 = vmatpush.msra.mxu3 %v89_v1  ;;  %v85_v7 = vld [vmem:[#allocation2 + $0x50] sm:$0xff]  ;;  %v84_v9 = vld [vmem:[#allocation2 + $0x48] sm:$0xff]  ;;  %v132_v10 = vld [vmem:[#allocation4 + $0x60] sm:$0xff]  ;;  %v208_v1 = vlaneseq }
  0x11   :  { %140 = vmatpush.msra.mxu1 %v135_v5  ;;  %v83_v11 = vld [vmem:[#allocation2 + $0x40] sm:$0xff]  ;;  %v131_v12 = vld [vmem:[#allocation4 + $0x58] sm:$0xff]  ;;  %v130_v14 = vld [vmem:[#allocation4 + $0x50] sm:$0xff] }
  0x12   :  { %97 = vmatpush.msra.mxu0 %v88_v2  ;;  %225 = vmatpush.msra.mxu3 %v88_v2  ;;  %v82_v13 = vld [vmem:[#allocation2 + $0x38] sm:$0xff]  ;;  %v81_v15 = vld [vmem:[#allocation2 + $0x30] sm:$0xff]  ;;  %v129_v16 = vld [vmem:[#allocation4 + $0x48] sm:$0xff] }
  0x13   :  { %141 = vmatpush.msra.mxu1 %v134_v6  ;;  %v80_v17 = vld [vmem:[#allocation2 + $0x28] sm:$0xff]  ;;  %v128_v18 = vld [vmem:[#allocation4 + $0x40] sm:$0xff]  ;;  %v127_v20 = vld [vmem:[#allocation4 + $0x38] sm:$0xff] }
  0x14   :  { %98 = vmatpush.msra.mxu0 %v87_v3  ;;  %226 = vmatpush.msra.mxu3 %v87_v3  ;;  %v79_v19 = vld [vmem:[#allocation2 + $0x20] sm:$0xff]  ;;  %v78_v21 = vld [vmem:[#allocation2 + $0x18] sm:$0xff]  ;;  %v126_v22 = vld [vmem:[#allocation4 + $0x30] sm:$0xff] }
  0x15   :  { %142 = vmatpush.msra.mxu1 %v133_v8  ;;  %v77_v23 = vld [vmem:[#allocation2 + $0x10] sm:$0xff]  ;;  %v125_v24 = vld [vmem:[#allocation4 + $0x28] sm:$0xff]  ;;  %v124_v26 = vld [vmem:[#allocation4 + $0x20] sm:$0xff] }
  0x16   :  { %99 = vmatpush.msra.mxu0 %v86_v4  ;;  %227 = vmatpush.msra.mxu3 %v86_v4  ;;  %v76_v25 = vld [vmem:[#allocation2 + $0x8] sm:$0xff]  ;;  %v75_v27 = vld [vmem:[#allocation2] sm:$0xff]  ;;  %v123_v30 = vld [vmem:[#allocation4 + $0x18] sm:$0xff]  ;;  %v209_v4 = vand.u32 127, %v208_v1 }
  0x17   :  { %143 = vmatpush.msra.mxu1 %v132_v10  ;;  %v73_v28 = vld [vmem:[%s402_s0] sm:$0xff]  ;;  %v74_v29 = vld [vmem:[%s402_s0 + $0x8] sm:$0xff]  ;;  %v122_v31 = vld [vmem:[#allocation4 + $0x10] sm:$0xff] }
  0x18   :  { %100 = vmatpush.msra.mxu0 %v85_v7  ;;  %228 = vmatpush.msra.mxu3 %v85_v7  ;;  %v121_v32 = vld [vmem:[#allocation4 + $0x8] sm:$0xff]  ;;  %v120_v33 = vld [vmem:[#allocation4] sm:$0xff]  ;;  %v180_v34 = vld [vmem:[#allocation6 + $0x78] sm:$0xff]  ;;  %vm210_vm0 = vcmp.eq.s32.totalorder %v209_v4, 28 }
  0x19   :  { %144 = vmatpush.msra.mxu1 %v131_v12  ;;  %v179_v35 = vld [vmem:[#allocation6 + $0x70] sm:$0xff]  ;;  %185 = vmatpush.msra.mxu2 %v180_v34  ;;  %v178_v36 = vld [vmem:[#allocation6 + $0x68] sm:$0xff]  ;;  %v177_v37 = vld [vmem:[#allocation6 + $0x60] sm:$0xff] }
  0x1a   :  { %101 = vmatpush.msra.mxu0 %v84_v9  ;;  %229 = vmatpush.msra.mxu3 %v84_v9  ;;  %v176_v38 = vld [vmem:[#allocation6 + $0x58] sm:$0xff]  ;;  %v175_v39 = vld [vmem:[#allocation6 + $0x50] sm:$0xff]  ;;  %v174_v40 = vld [vmem:[#allocation6 + $0x48] sm:$0xff] }
  0x1b   :  { %145 = vmatpush.msra.mxu1 %v130_v14  ;;  %186 = vmatpush.msra.mxu2 %v179_v35  ;;  %v173_v41 = vld [vmem:[#allocation6 + $0x40] sm:$0xff]  ;;  %v172_v42 = vld [vmem:[#allocation6 + $0x38] sm:$0xff]  ;;  %v171_v44 = vld [vmem:[#allocation6 + $0x30] sm:$0xff] }
  0x1c   :  { %102 = vmatpush.msra.mxu0 %v83_v11  ;;  %230 = vmatpush.msra.mxu3 %v83_v11  ;;  %v244_v43 = vld [vmem:[%s404_s2] ss:$0 sm:$0xff]  ;;  %v170_v45 = vld [vmem:[#allocation6 + $0x28] sm:$0xff]  ;;  %v168_v50 = vld [vmem:[#allocation6 + $0x18] sm:$0xff] }
  0x1d   :  { %146 = vmatpush.msra.mxu1 %v129_v16  ;;  %187 = vmatpush.msra.mxu2 %v178_v36  ;;  %v169_v48 = vld [vmem:[#allocation6 + $0x20] sm:$0xff]  ;;  %v167_v54 = vld [vmem:[#allocation6 + $0x10] sm:$0xff]  ;;  %v166_v55 = vld [vmem:[#allocation6 + $0x8] sm:$0xff] }
  0x1e   :  { %103 = vmatpush.msra.mxu0 %v82_v13  ;;  %231 = vmatpush.msra.mxu3 %v82_v13  ;;  %v165_v56 = vld [vmem:[#allocation6] sm:$0xff] }
  0x1f   :  { %147 = vmatpush.msra.mxu1 %v128_v18  ;;  %188 = vmatpush.msra.mxu2 %v177_v37  ;;  %v245_v57 = vld [vmem:[%s406_s4] ss:$0 sm:$0xff] }
  0x20   :  { %104 = vmatpush.msra.mxu0 %v81_v15  ;;  %232 = vmatpush.msra.mxu3 %v81_v15  ;;  %v246_v0 = vld [vmem:[%s408_s6] ss:$0 sm:$0xff] }
  0x21   :  { %148 = vmatpush.msra.mxu1 %v127_v20  ;;  %189 = vmatpush.msra.mxu2 %v176_v38 }
  0x22   :  { %105 = vmatpush.msra.mxu0 %v80_v17  ;;  %233 = vmatpush.msra.mxu3 %v80_v17 }
  0x23   :  { %149 = vmatpush.msra.mxu1 %v126_v22  ;;  %190 = vmatpush.msra.mxu2 %v175_v39 }
  0x24   :  { %106 = vmatpush.msra.mxu0 %v79_v19  ;;  %234 = vmatpush.msra.mxu3 %v79_v19 }
  0x25   :  { %150 = vmatpush.msra.mxu1 %v125_v24  ;;  %191 = vmatpush.msra.mxu2 %v174_v40 }
  0x26   :  { %107 = vmatpush.msra.mxu0 %v78_v21  ;;  %235 = vmatpush.msra.mxu3 %v78_v21 }
  0x27   :  { %151 = vmatpush.msra.mxu1 %v124_v26  ;;  %192 = vmatpush.msra.mxu2 %v173_v41 }
  0x28   :  { %108 = vmatpush.msra.mxu0 %v77_v23  ;;  %236 = vmatpush.msra.mxu3 %v77_v23 }
  0x29   :  { %152 = vmatpush.msra.mxu1 %v123_v30  ;;  %193 = vmatpush.msra.mxu2 %v172_v42 }
  0x2a   :  { %109 = vmatpush.msra.mxu0 %v76_v25  ;;  %237 = vmatpush.msra.mxu3 %v76_v25 }
  0x2b   :  { %153 = vmatpush.msra.mxu1 %v122_v31  ;;  %194 = vmatpush.msra.mxu2 %v171_v44 }
  0x2c   :  { %110 = vmatpush.msra.mxu0 %v75_v27  ;;  %238 = vmatpush.msra.mxu3 %v75_v27 }
  0x2d   :  { %111 = vmatmul.f32.vlgmr.msra.gmra.mxu0 %v73_v28  ;;  %114 = vmatmul.f32.vlgmr.msra.gmra.mxu3 %v74_v29 }
  0x2e   :  { %154 = vmatpush.msra.mxu1 %v121_v32  ;;  %195 = vmatpush.msra.mxu2 %v170_v45 }
  0x30   :  { %155 = vmatpush.msra.mxu1 %v120_v33  ;;  %196 = vmatpush.msra.mxu2 %v169_v48 }
  0x32   :  { %197 = vmatpush.msra.mxu2 %v168_v50 }
  0x34   :  { %198 = vmatpush.msra.mxu2 %v167_v54 }
  0x36   :  { %199 = vmatpush.msra.mxu2 %v166_v55 }
  0x38   :  { %200 = vmatpush.msra.mxu2 %v165_v56 }
  0xaa   :  { %v112_v46 = vpop.f32.mrf.mxu0 }
  0xab   :  { %v113_v47 = vadd.f32 %v244_v43, %v112_v46 }
  0xad   :  { %v118_v49 = vmax.f32 %v113_v47, 0.0 }
  0xaf   :  { %156 = vmatmul.f32.vlgmr.msra.gmra.mxu1 %v118_v49 }
  0xb0   :  { %v115_v51 = vpop.f32.mrf.mxu3 }
  0xb1   :  { %v116_v52 = vadd.f32 %v244_v43, %v115_v51 }
  0xb3   :  { %v119_v53 = vmax.f32 %v116_v52, 0.0 }
  0xb7   :  { %159 = vmatmul.f32.gmra.mxu1 %v119_v53 }
 0x12c   :  { %v157_v58 = vpop.f32.mrf.mxu1 }
 0x12d   :  { %v158_v59 = vadd.f32 %v245_v57, %v157_v58 }
 0x12f   :  { %v163_v60 = vmax.f32 %v158_v59, 0.0 }
 0x131   :  { %201 = vmatmul.f32.vlgmr.msra.gmra.mxu2 %v163_v60 }
 0x134   :  { %v160_v61 = vpop.f32.mrf.mxu1 }
 0x135   :  { %v161_v62 = vadd.f32 %v245_v57, %v160_v61 }
 0x137   :  { %v164_v63 = vmax.f32 %v161_v62, 0.0 }
 0x139   :  { %204 = vmatmul.f32.gmra.mxu2 %v164_v63 }
 0x1b4   :  { %v202_v2 = vpop.f32.mrf.mxu2 }
 0x1b5   :  { %v203_v3 = vadd.f32 %v246_v0, %v202_v2 }
 0x1b7   :  { %247 = vtanh.f32 %v203_v3 }
 0x1bc   :  { %v205_v5 = vpop.f32.mrf.mxu2 }
 0x1bd   :  { %v248_v6 = vpop.eup %247  ;;  %v206_v7 = vadd.f32 %v246_v0, %v205_v5 }
 0x1be   :  { %v213_v8 = vsel %vm210_vm0, %v248_v6, %v203_v3 }
 0x1bf   :  { %215 = vst [vmem:[%s409_s7] sm:$0xff] %v213_v8  ;;  %249 = vtanh.f32 %v206_v7 }
 0x1c5   :  { %v250_v9 = vpop.eup %249 }
 0x1c6   :  { %v214_v10 = vsel %vm210_vm0, %v250_v9, %v206_v7 }
 0x1c7   :  { %216 = vst [vmem:[%s409_s7 + $0x8] sm:$0xff] %v214_v10 }
 0x1c8   :  { %221 = vsyncpa [#allocation3], 1 }
 0x1c9   :  { %222 = vsyncpa [#allocation5], 1 }

</bundles_post_ra>
